<compile_context>
chip_gen: v7x
topology: tpu7x:2x2x1
jax: 0.10.0
libtpu: 0.0.40
codegen_flags: <defaults>
</compile_context>

<pallas_src>
import jax
import jax.numpy as jnp
from jax.experimental import pallas as pl
from jax.experimental.pallas import tpu as pltpu


def _gumbel_kernel(temp_ref, logits_ref, u_ref, out_ref):
    """Fused gumbel_softmax(hard=False) + sigmoid for both parameter rows.

    temp_ref   : SMEM (1,)   f32 -- softmax temperature
    logits_ref : VMEM (2, N) f32 -- row 0: gumbel ('feature'), row 1: gumbel_w
    u_ref      : VMEM (2, N) f32 -- uniform(0,1) noise (generated in-jit)
    out_ref    : VMEM (4, N) f32 -- rows 0..1: soft samples, rows 2..3: sigmoid
    """
    eps = 1e-20
    logits = logits_ref[...]
    u = u_ref[...]

    # ---- gumbel-softmax (soft, dim=-1) -------------------------------------
    g = -jnp.log(-jnp.log(u + eps) + eps)          # gumbel noise
    inv_temp = 1.0 / temp_ref[0]                   # scalar reciprocal (SMEM)
    y = (logits + g) * inv_temp
    y = y - jnp.max(y, axis=-1, keepdims=True)     # stable softmax
    e = jnp.exp(y)
    w = e / jnp.sum(e, axis=-1, keepdims=True)     # exact division

    # ---- sigmoid via tanh (stable, short dependency chain) -----------------
    p = 0.5 * (jnp.tanh(0.5 * logits) + 1.0)

    # single fused store: [w_feature; w_classifier; p_feature; p_classifier]
    out_ref[...] = jnp.concatenate([w, p], axis=0)


@jax.jit
def _task_gumbel(logits_stacked, temp, key):
    """One dispatch: noise gen + fused Pallas kernel + output slicing."""
    n = logits_stacked.shape[1]
    temp_arr = jnp.reshape(temp.astype(jnp.float32), (1,))
    u = jax.random.uniform(key, logits_stacked.shape, dtype=jnp.float32)

    out = pl.pallas_call(
        _gumbel_kernel,
        out_shape=jax.ShapeDtypeStruct((4, n), jnp.float32),
        in_specs=[
            pl.BlockSpec(memory_space=pltpu.SMEM),   # temp  (1,)   f32
            pl.BlockSpec(memory_space=pltpu.VMEM),   # logits (2,N) f32
            pl.BlockSpec(memory_space=pltpu.VMEM),   # uniforms (2,N) f32
        ],
        out_specs=pl.BlockSpec(memory_space=pltpu.VMEM),
        cost_estimate=pl.CostEstimate(
            flops=40 * n, transcendentals=8 * n, bytes_accessed=36 * n),
    )(temp_arr, logits_stacked, u)

    # .transpose(0, 1) on a (1, N) row == metadata-only reshape to (N, 1);
    # done inside the same jit so the slices fuse into this executable.
    w_feat = out[0].reshape(n, 1)
    w_cls = out[1].reshape(n, 1)
    p_feat = out[2].reshape(n, 1)
    p_cls = out[3].reshape(n, 1)
    return w_feat, p_feat, w_cls, p_cls


class TaskSpecificGumbel:
    """JAX/Pallas re-implementation of task_specific_gumbel."""

    def __init__(self, d_task: int):
        n = d_task - 1
        # nn.init.constant_(..., 0.0) for both (1, d_task-1) parameters,
        # kept pre-stacked as one persistent (2, N) buffer:
        #   row 0 == self.gumbel ('feature'), row 1 == self.gumbel_w ('classifier')
        self.logits = jnp.zeros((2, n), jnp.float32)

    def forward_both(self, temp: float, key):
        """One fused dispatch computes BOTH 'feature' and 'classifier' paths."""
        w_f, p_f, w_c, p_c = _task_gumbel(
            self.logits, jnp.asarray(temp, dtype=jnp.float32), key)
        return (w_f, p_f), (w_c, p_c)

    def forward(self, temp: float, gumbel_type: str, key):
        (w_f, p_f), (w_c, p_c) = self.forward_both(temp, key)
        if gumbel_type == "feature":
            return w_f, p_f
        elif gumbel_type == "classifier":
            return w_c, p_c
        raise ValueError(f"unknown gumbel_type: {gumbel_type}")


if __name__ == "__main__":
    d_task = 8                      # logits are (1, 7) per parameter
    temp = 0.5
    n = d_task - 1

    key = jax.random.PRNGKey(0)

    module = TaskSpecificGumbel(d_task)
    (w_feat, p_feat), (w_cls, p_cls) = module.forward_both(temp, key)
    jax.block_until_ready((w_feat, p_feat, w_cls, p_cls))

    # Sanity checks: shapes, exact softmax normalization, sigmoid(0) == 0.5
    # for the zero-initialized parameters.
    assert w_feat.shape == (n, 1) and p_feat.shape == (n, 1)
    assert w_cls.shape == (n, 1) and p_cls.shape == (n, 1)
    assert abs(float(jnp.sum(w_feat)) - 1.0) < 1e-5
    assert abs(float(jnp.sum(w_cls)) - 1.0) < 1e-5
    assert bool(jnp.allclose(p_feat, 0.5, atol=1e-6))
    assert bool(jnp.allclose(p_cls, 0.5, atol=1e-6))

    print("KERNEL_OK")
</pallas_src>

<mosaic_0001>
module attributes {stable_mosaic.version = 11 : i64} {
  func.func @_gumbel_kernel(%arg0: memref<1xf32, #tpu.memory_space<smem>>, %arg1: memref<2x7xf32, #tpu.memory_space<vmem>>, %arg2: memref<2x7xf32, #tpu.memory_space<vmem>>, %arg3: memref<4x7xf32, #tpu.memory_space<vmem>>) attributes {dimension_semantics = [], scalar_prefetch = 0 : i64, scratch_operands = 0 : i64, tpu.core_type = #tpu.core_type<tc>} {
    %c0 = arith.constant 0 : index
    %c0_0 = arith.constant 0 : index
    %0 = vector.load %arg1[%c0, %c0_0] : memref<2x7xf32, #tpu.memory_space<vmem>>, vector<2x7xf32>
    %c0_1 = arith.constant 0 : index
    %c0_2 = arith.constant 0 : index
    %1 = vector.load %arg2[%c0_1, %c0_2] : memref<2x7xf32, #tpu.memory_space<vmem>>, vector<2x7xf32>
    %cst = arith.constant 9.99999968E-21 : f32
    %2 = vector.broadcast %cst : f32 to vector<2x7xf32>
    %3 = arith.addf %1, %2 : vector<2x7xf32>
    %4 = math.log %3 : vector<2x7xf32>
    %cst_3 = arith.constant 0.000000e+00 : f32
    %5 = vector.broadcast %cst_3 : f32 to vector<2x7xf32>
    %6 = arith.subf %5, %4 : vector<2x7xf32>
    %cst_4 = arith.constant 9.99999968E-21 : f32
    %7 = vector.broadcast %cst_4 : f32 to vector<2x7xf32>
    %8 = arith.addf %6, %7 : vector<2x7xf32>
    %9 = math.log %8 : vector<2x7xf32>
    %cst_5 = arith.constant 0.000000e+00 : f32
    %10 = vector.broadcast %cst_5 : f32 to vector<2x7xf32>
    %11 = arith.subf %10, %9 : vector<2x7xf32>
    %c0_6 = arith.constant 0 : index
    %12 = memref.load %arg0[%c0_6] : memref<1xf32, #tpu.memory_space<smem>>
    %cst_7 = arith.constant 1.000000e+00 : f32
    %13 = arith.divf %cst_7, %12 : f32
    %14 = arith.addf %0, %11 : vector<2x7xf32>
    %15 = vector.broadcast %13 : f32 to vector<2x7xf32>
    %16 = arith.mulf %14, %15 : vector<2x7xf32>
    %cst_8 = arith.constant dense<0xFF800000> : vector<2xf32>
    %17 = vector.multi_reduction <maximumf>, %16, %cst_8 [1] : vector<2x7xf32> to vector<2xf32>
    %18 = vector.shape_cast %17 : vector<2xf32> to vector<2x1xf32>
    %19 = vector.broadcast %18 : vector<2x1xf32> to vector<2x7xf32>
    %20 = arith.subf %16, %19 : vector<2x7xf32>
    %21 = math.exp %20 : vector<2x7xf32>
    %cst_9 = arith.constant dense<0.000000e+00> : vector<2xf32>
    %22 = vector.multi_reduction <add>, %21, %cst_9 [1] : vector<2x7xf32> to vector<2xf32>
    %23 = vector.shape_cast %22 : vector<2xf32> to vector<2x1xf32>
    %24 = vector.broadcast %23 : vector<2x1xf32> to vector<2x7xf32>
    %25 = arith.divf %21, %24 : vector<2x7xf32>
    %cst_10 = arith.constant 5.000000e-01 : f32
    %26 = vector.broadcast %cst_10 : f32 to vector<2x7xf32>
    %27 = arith.mulf %26, %0 : vector<2x7xf32>
    %28 = math.tanh %27 : vector<2x7xf32>
    %cst_11 = arith.constant 1.000000e+00 : f32
    %29 = vector.broadcast %cst_11 : f32 to vector<2x7xf32>
    %30 = arith.addf %28, %29 : vector<2x7xf32>
    %cst_12 = arith.constant 5.000000e-01 : f32
    %31 = vector.broadcast %cst_12 : f32 to vector<2x7xf32>
    %32 = arith.mulf %31, %30 : vector<2x7xf32>
    %33 = tpu.concatenate %25, %32 in 0 : vector<2x7xf32>, vector<2x7xf32> -> vector<4x7xf32>
    %c0_13 = arith.constant 0 : index
    %c0_14 = arith.constant 0 : index
    %34 = vector.load %arg3[%c0_13, %c0_14] : memref<4x7xf32, #tpu.memory_space<vmem>>, vector<4x7xf32>
    tpu.vector_store %arg3[%c0_13, %c0_14], %33 {strides = array<i32>} : memref<4x7xf32, #tpu.memory_space<vmem>>, vector<4x7xf32>,
    return
  }
}

</mosaic_0001>

<bundles_post_ra>
// kernel: _task_gumbel.1
= control target key start
LH: loop header
LB: loop body
LE: loop exit
PB: predicated region body
PF: predicated region fallthrough
CT: control target
= control target key end

     0   :  { %vm32_vm0 = vcmask 50176   ;;  %vm51_vm1 = vcmask 1041408   ;;  %vm53_vm2 = vcmask 52224   ;;  %s105_s0 = inlined_call_operand.<no memory space> [shape: f32[1], index: 0, kind: input, shape index: {}]   ;;  %s106_s2 = inlined_call_operand.vmem [shape: f32[2,7], index: 2, kind: input, shape index: {}]   ;;  %s107_s1 = inlined_call_operand.vmem [shape: f32[2,7], index: 1, kind: input, shape index: {}]   ;;  %s108_s3 = inlined_call_operand.vmem [shape: f32[4,7], index: 3, kind: output, shape index: {}]  }
   0x1   :  { %v26_v0 = vstv %s105_s0  ;;  %v16_v1 = vld [vmem:[%s106_s2] sm:$0x3] }
   0x2   :  { %61 = vrcp.f32 %v26_v0  ;;  %v17_v2 = vadd.f32 1e-20, %v16_v1  ;;  %v15_v11 = vld [vmem:[%s107_s1] sm:$0x3] }
   0x3   :  { %v44_v21 = vmul.f32 0.5, %v15_v11 }
   0x4   :  { %63 = vlog2.f32 %v17_v2 }
   0xc   :  { %v62_v3 = vpop.eup %61 }
   0xd   :  { %59 = vpush %v62_v3 }
   0xe   :  { %v64_v4 = vpop.eup %63 }
   0xf   :  { %v19_v5 = vmul.f32 0.6931472, %v64_v4 }
  0x11   :  { %v20_v6 = vsub.f32 0.0, %v19_v5 }
  0x13   :  { %v21_v7 = vadd.f32 1e-20, %v20_v6 }
  0x15   :  { %65 = vlog2.f32 %v21_v7 }
  0x1f   :  { %v66_v8 = vpop.eup %65 }
  0x20   :  { %v23_v9 = vmul.f32 0.6931472, %v66_v8 }
  0x22   :  { %v24_v10 = vsub.f32 0.0, %v23_v9 }
  0x24   :  { %v29_v12 = vadd.f32 %v24_v10, %v15_v11 }
  0x3e   :  { %s60_s0 = spop %59 }
  0x3f   :  { %v30_v13 = vstv %s60_s0 }
  0x40   :  { %v31_v14 = vmul.f32 %v30_v13, %v29_v12 }
  0x42   :  { %v33_v15 = vsel %vm32_vm0, %v31_v14, -inf }
  0x43   :  { %34 = vmax.xlane.f32.xlu0 %v33_v15 }
  0xd0   :  { %v35_v16 = vpop.xlane.xlu0 %34 }
  0xd1   :  { %v36_v17 = vsub.f32 %v31_v14, %v35_v16 }
  0xd3   :  { %v37_v18 = vmul.f32 1.442695, %v36_v17 }
  0xd5   :  { %67 = vpow2.f32 %v37_v18 }
  0xd6   :  { %69 = vtanh.f32 %v44_v21 }
  0xdf   :  { %v68_v19 = vpop.eup %67 }
  0xe0   :  { %v39_v20 = vsel %vm32_vm0, %v68_v19, 0.0  ;;  %v70_v22 = vpop.eup %69 }
  0xe1   :  { %40 = vadd.xlane.f32.xlu0 %v39_v20  ;;  %v46_v24 = vadd.f32 1.0, %v70_v22 }
  0xe3   :  { %v47_v25 = vmul.f32 0.5, %v46_v24 }
  0xe5   :  { %v49_v26 = vrot.slane %v47_v25, 6 }
 0x16e   :  { %v41_v23 = vpop.xlane.xlu0 %40 }
 0x16f   :  { %71 = vrcp.f32 %v41_v23 }
 0x179   :  { %v72_v27 = vpop.eup %71 }
 0x17a   :  { %v43_v28 = vmul.f32 %v72_v27, %v68_v19 }
 0x17c   :  { %v52_v29 = vsel %vm51_vm1, %v43_v28, %v49_v26 }
 0x17d   :  { %54 = vst.msk [vmem:[%s108_s3] sm:$0xf] %vm53_vm2, %v52_v29 }

</bundles_post_ra>
